<compile_context>
chip_gen: v5e
topology: v5e:2x2
jax: 0.10.0
libtpu: 0.0.40
codegen_flags: <defaults>
</compile_context>

<pallas_src>
import functools

import jax
import jax.numpy as jnp
from jax.experimental import pallas as pl
from jax.experimental.pallas import tpu as pltpu


def fused_relu_conv1x1_bn_kernel(x_ref, w_ref, gamma_ref, beta_ref, o_ref, *,
                                 eps, inv_count):
    """x_ref: (N, HW, C_in) bf16; w_ref: (C_in, tn) bf16;
    gamma/beta: (1, tn) f32; o_ref: (N, HW, tn) f32."""
    n_batch = x_ref.shape[0]
    tn = w_ref.shape[1]
    w = w_ref[...]                                      # (C_in, tn) bf16

    # Pass 1: ReLU + 1x1 conv (MXU matmul, lane-dense result) per image.
    # Stage y directly in the VMEM output block; accumulate per-channel sums.
    ch_sum = jnp.zeros((1, tn), dtype=jnp.float32)
    for n in range(n_batch):                            # N is small (1 in the module)
        x_n = jnp.maximum(x_ref[n], 0.0)                # (HW, C_in) bf16
        y_n = jnp.dot(x_n, w, preferred_element_type=jnp.float32)   # (HW, tn) f32
        o_ref[n] = y_n
        ch_sum = ch_sum + jnp.sum(y_n, axis=0, keepdims=True)

    mean = ch_sum * inv_count                           # (1, tn)

    # Pass 2: centered sum of squares (numerically stable variance), reading
    # the staged conv outputs back from VMEM.
    ssq = jnp.zeros_like(mean)
    for n in range(n_batch):
        d = o_ref[n] - mean
        ssq = ssq + jnp.sum(d * d, axis=0, keepdims=True)
    var = ssq * inv_count

    scale = gamma_ref[...] * jax.lax.rsqrt(var + eps)   # (1, tn)
    shift = beta_ref[...] - mean * scale

    # Pass 3: normalize + affine in place (lane-dense, unmasked stores).
    for n in range(n_batch):
        o_ref[n] = o_ref[n] * scale + shift


def _round_up(v, m):
    return ((v + m - 1) // m) * m


def _pick_channel_tile(c_out):
    # Prefer exactly 2 grid steps: amortizes the ~0.35us/step overhead and the
    # per-step ReLU recompute while keeping >=2 steps so both v7x TensorCores
    # get work. Cap the tile so the weight block stays modest.
    half = c_out // 2
    if half >= 128 and half % 128 == 0 and half <= 1024:
        return half
    for cand in (512, 256, 128):
        if c_out % cand == 0:
            return cand
    return c_out


def module_forward(x_nchw, conv_w, bn_gamma, bn_beta, *, eps=1e-5, tn=None):
    n, c_in, h, w = x_nchw.shape
    c_out = conv_w.shape[0]
    hw = h * w
    if tn is None:
        tn = _pick_channel_tile(c_out)
    assert c_out % tn == 0, "channel tile must divide C_out"

    # One NHWC-style transpose so the channel tile lands on the lane (last)
    # dimension of the output. bf16 MXU inputs; accumulation stays fp32.
    x3 = x_nchw.reshape(n, c_in, hw).transpose(0, 2, 1).astype(jnp.bfloat16)  # (N, HW, C_in)
    w2 = conv_w.reshape(c_out, c_in).T.astype(jnp.bfloat16)                   # (C_in, C_out)
    g2 = bn_gamma.reshape(1, c_out).astype(jnp.float32)
    b2 = bn_beta.reshape(1, c_out).astype(jnp.float32)

    # Explicit VMEM budget (double-buffered blocks). Cap at 48 MiB so there is
    # headroom on v7x (64 MiB physical); v5e/v6e (128 MiB) could go higher.
    bf, fp = 2, 4
    x_bytes = n * _round_up(hw, 16) * _round_up(c_in, 128) * bf
    w_bytes = _round_up(c_in, 16) * _round_up(tn, 128) * bf
    o_bytes = n * _round_up(hw, 8) * _round_up(tn, 128) * fp
    v_bytes = 2 * 8 * _round_up(tn, 128) * fp
    est = 2 * (x_bytes + w_bytes + o_bytes + v_bytes) + (2 << 20)
    vmem_limit = int(min(max(est, 16 << 20), 48 << 20))

    # TODO(synk): on v7x with very large activations, single-buffer the
    # resident x block (pipeline_mode=pl.Buffered(1); constant index_map makes
    # double-buffering useless) or fall back to a tiled two-pass stats scheme.

    out = pl.pallas_call(
        functools.partial(fused_relu_conv1x1_bn_kernel,
                          eps=float(eps), inv_count=1.0 / float(n * hw)),
        out_shape=jax.ShapeDtypeStruct((n, hw, c_out), jnp.float32),
        grid_spec=pltpu.PrefetchScalarGridSpec(
            num_scalar_prefetch=0,
            grid=(c_out // tn,),
            in_specs=[
                pl.BlockSpec((n, hw, c_in), lambda j: (0, 0, 0)),  # resident in VMEM
                pl.BlockSpec((c_in, tn), lambda j: (0, j)),
                pl.BlockSpec((1, tn), lambda j: (0, j)),
                pl.BlockSpec((1, tn), lambda j: (0, j)),
            ],
            out_specs=pl.BlockSpec((n, hw, tn), lambda j: (0, 0, j)),
        ),
        compiler_params=pltpu.CompilerParams(
            dimension_semantics=("parallel",),
            vmem_limit_bytes=vmem_limit),
    )(x3, w2, g2, b2)

    # Back to NCHW.
    return out.transpose(0, 2, 1).reshape(n, c_out, h, w)


if __name__ == "__main__":
    # Small shapes consistent with the module structure
    # (original: N=1, C_in=C_out=1024, H=W=14). Scaled down; HW=49 is
    # deliberately NOT tile-aligned, and C_OUT=256 gives 2 channel grid steps.
    N, C_IN, C_OUT, H, W = 2, 256, 256, 7, 7

    key = jax.random.PRNGKey(0)
    kx, kw, kg, kb = jax.random.split(key, 4)

    x = jax.random.normal(kx, (N, C_IN, H, W), dtype=jnp.float32)
    # Conv2d(C_in, C_out, 1x1, bias=False) weight: (C_out, C_in, 1, 1)
    conv_w = jax.random.normal(kw, (C_OUT, C_IN, 1, 1), dtype=jnp.float32) * 0.05
    # Non-trivial affine params to exercise gamma/beta paths.
    bn_gamma = 1.0 + 0.1 * jax.random.normal(kg, (C_OUT,), dtype=jnp.float32)
    bn_beta = 0.1 * jax.random.normal(kb, (C_OUT,), dtype=jnp.float32)

    out = module_forward(x, conv_w, bn_gamma, bn_beta, eps=1e-5)
    out = jax.block_until_ready(out)

    # Reference 1: same bf16 input quantization as the kernel (tight check of
    # kernel logic; fp32 accumulation everywhere).
    xb = x.astype(jnp.bfloat16).astype(jnp.float32)
    wb = conv_w.reshape(C_OUT, C_IN).astype(jnp.bfloat16).astype(jnp.float32)
    y_ref = jnp.einsum("oc,nchw->nohw", wb, jnp.maximum(xb, 0.0))
    mean = y_ref.mean(axis=(0, 2, 3), keepdims=True)
    var = ((y_ref - mean) ** 2).mean(axis=(0, 2, 3), keepdims=True)
    z_ref = ((y_ref - mean) / jnp.sqrt(var + 1e-5)
             * bn_gamma.reshape(1, -1, 1, 1) + bn_beta.reshape(1, -1, 1, 1))
    assert out.shape == z_ref.shape
    assert jnp.allclose(out, z_ref, atol=2e-3, rtol=2e-3), "mismatch vs bf16-consistent reference"

    # Reference 2: pure fp32 PyTorch-equivalent semantics (loose sanity check;
    # difference is bf16 input quantization only).
    # TODO(synk): running_mean/running_var momentum update is a stateful
    # training side-effect and is not part of the returned tensor.
    y32 = jnp.einsum("oc,nchw->nohw", conv_w.reshape(C_OUT, C_IN), jnp.maximum(x, 0.0))
    m32 = y32.mean(axis=(0, 2, 3), keepdims=True)
    v32 = ((y32 - m32) ** 2).mean(axis=(0, 2, 3), keepdims=True)
    z32 = ((y32 - m32) / jnp.sqrt(v32 + 1e-5)
           * bn_gamma.reshape(1, -1, 1, 1) + bn_beta.reshape(1, -1, 1, 1))
    assert jnp.allclose(out, z32, atol=7.5e-2, rtol=7.5e-2), "mismatch vs fp32 reference"

    print("KERNEL_OK")
</pallas_src>

<mosaic_0001>
module attributes {stable_mosaic.version = 11 : i64} {
  func.func @fused_relu_conv1x1_bn_kernel(%arg0: i32, %arg1: memref<2x49x256xbf16, #tpu.memory_space<vmem>>, %arg2: memref<256x128xbf16, #tpu.memory_space<vmem>>, %arg3: memref<1x128xf32, #tpu.memory_space<vmem>>, %arg4: memref<1x128xf32, #tpu.memory_space<vmem>>, %arg5: memref<2x49x128xf32, #tpu.memory_space<vmem>>) attributes {dimension_semantics = [#tpu.dimension_semantics<parallel>], iteration_bounds = array<i64: 2>, scalar_prefetch = 0 : i64, scratch_operands = 0 : i64, tpu.core_type = #tpu.core_type<tc>, window_params = [{pipeline_mode = #tpu.pipeline_mode<synchronous>, transform_indices = @transform_0, window_bounds = array<i64: 2, 49, 256>}, {transform_indices = @transform_1, window_bounds = array<i64: 256, 128>}, {transform_indices = @transform_2, window_bounds = array<i64: 1, 128>}, {transform_indices = @transform_3, window_bounds = array<i64: 1, 128>}, {transform_indices = @transform_4, window_bounds = array<i64: 2, 49, 128>}]} {
    %c0 = arith.constant 0 : index
    %c0_0 = arith.constant 0 : index
    %0 = vector.load %arg2[%c0, %c0_0] : memref<256x128xbf16, #tpu.memory_space<vmem>>, vector<256x128xbf16>
    %cst = arith.constant 0.000000e+00 : f32
    %1 = vector.broadcast %cst : f32 to vector<1x128xf32>
    %c0_1 = arith.constant 0 : index
    %c0_2 = arith.constant 0 : index
    %c0_3 = arith.constant 0 : index
    %2 = vector.load %arg1[%c0_1, %c0_2, %c0_3] : memref<2x49x256xbf16, #tpu.memory_space<vmem>>, vector<1x49x256xbf16>
    %3 = vector.shape_cast %2 : vector<1x49x256xbf16> to vector<49x256xbf16>
    %cst_4 = arith.constant 0.000000e+00 : bf16
    %4 = vector.broadcast %cst_4 : bf16 to vector<49x256xbf16>
    %5 = arith.maximumf %3, %4 : vector<49x256xbf16>
    %cst_5 = arith.constant dense<0.000000e+00> : vector<49x128xf32>
    %6 = tpu.matmul %5, %0, %cst_5 {dimension_numbers = #tpu.dot_dimension_numbers<[1], [0], [0], [1], [0, 0, 1, 1], [], []>} : vector<49x256xbf16>, vector<256x128xbf16>, vector<49x128xf32> -> vector<49x128xf32>
    %c0_6 = arith.constant 0 : index
    %c0_7 = arith.constant 0 : index
    %c0_8 = arith.constant 0 : index
    %7 = vector.load %arg5[%c0_6, %c0_7, %c0_8] : memref<2x49x128xf32, #tpu.memory_space<vmem>>, vector<1x49x128xf32>
    %8 = vector.shape_cast %7 : vector<1x49x128xf32> to vector<49x128xf32>
    %9 = vector.shape_cast %6 : vector<49x128xf32> to vector<1x49x128xf32>
    tpu.vector_store %arg5[%c0_6, %c0_7, %c0_8], %9 {strides = array<i32>} : memref<2x49x128xf32, #tpu.memory_space<vmem>>, vector<1x49x128xf32>,
    %cst_9 = arith.constant dense<0.000000e+00> : vector<128xf32>
    %10 = vector.multi_reduction <add>, %6, %cst_9 [0] : vector<49x128xf32> to vector<128xf32>
    %11 = vector.shape_cast %10 : vector<128xf32> to vector<1x128xf32>
    %12 = arith.addf %1, %11 : vector<1x128xf32>
    %c1 = arith.constant 1 : index
    %c0_10 = arith.constant 0 : index
    %c0_11 = arith.constant 0 : index
    %13 = vector.load %arg1[%c1, %c0_10, %c0_11] : memref<2x49x256xbf16, #tpu.memory_space<vmem>>, vector<1x49x256xbf16>
    %14 = vector.shape_cast %13 : vector<1x49x256xbf16> to vector<49x256xbf16>
    %cst_12 = arith.constant 0.000000e+00 : bf16
    %15 = vector.broadcast %cst_12 : bf16 to vector<49x256xbf16>
    %16 = arith.maximumf %14, %15 : vector<49x256xbf16>
    %cst_13 = arith.constant dense<0.000000e+00> : vector<49x128xf32>
    %17 = tpu.matmul %16, %0, %cst_13 {dimension_numbers = #tpu.dot_dimension_numbers<[1], [0], [0], [1], [0, 0, 1, 1], [], []>} : vector<49x256xbf16>, vector<256x128xbf16>, vector<49x128xf32> -> vector<49x128xf32>
    %c1_14 = arith.constant 1 : index
    %c0_15 = arith.constant 0 : index
    %c0_16 = arith.constant 0 : index
    %18 = vector.load %arg5[%c1_14, %c0_15, %c0_16] : memref<2x49x128xf32, #tpu.memory_space<vmem>>, vector<1x49x128xf32>
    %19 = vector.shape_cast %18 : vector<1x49x128xf32> to vector<49x128xf32>
    %20 = vector.shape_cast %17 : vector<49x128xf32> to vector<1x49x128xf32>
    tpu.vector_store %arg5[%c1_14, %c0_15, %c0_16], %20 {strides = array<i32>} : memref<2x49x128xf32, #tpu.memory_space<vmem>>, vector<1x49x128xf32>,
    %cst_17 = arith.constant dense<0.000000e+00> : vector<128xf32>
    %21 = vector.multi_reduction <add>, %17, %cst_17 [0] : vector<49x128xf32> to vector<128xf32>
    %22 = vector.shape_cast %21 : vector<128xf32> to vector<1x128xf32>
    %23 = arith.addf %12, %22 : vector<1x128xf32>
    %cst_18 = arith.constant 0.0102040814 : f32
    %24 = vector.broadcast %cst_18 : f32 to vector<1x128xf32>
    %25 = arith.mulf %23, %24 : vector<1x128xf32>
    %cst_19 = arith.constant 0.000000e+00 : f32
    %26 = vector.broadcast %cst_19 : f32 to vector<1x128xf32>
    %c0_20 = arith.constant 0 : index
    %c0_21 = arith.constant 0 : index
    %c0_22 = arith.constant 0 : index
    %27 = vector.load %arg5[%c0_20, %c0_21, %c0_22] : memref<2x49x128xf32, #tpu.memory_space<vmem>>, vector<1x49x128xf32>
    %28 = vector.shape_cast %27 : vector<1x49x128xf32> to vector<49x128xf32>
    %29 = vector.broadcast %25 : vector<1x128xf32> to vector<49x128xf32>
    %30 = arith.subf %28, %29 : vector<49x128xf32>
    %31 = arith.mulf %30, %30 : vector<49x128xf32>
    %cst_23 = arith.constant dense<0.000000e+00> : vector<128xf32>
    %32 = vector.multi_reduction <add>, %31, %cst_23 [0] : vector<49x128xf32> to vector<128xf32>
    %33 = vector.shape_cast %32 : vector<128xf32> to vector<1x128xf32>
    %34 = arith.addf %26, %33 : vector<1x128xf32>
    %c1_24 = arith.constant 1 : index
    %c0_25 = arith.constant 0 : index
    %c0_26 = arith.constant 0 : index
    %35 = vector.load %arg5[%c1_24, %c0_25, %c0_26] : memref<2x49x128xf32, #tpu.memory_space<vmem>>, vector<1x49x128xf32>
    %36 = vector.shape_cast %35 : vector<1x49x128xf32> to vector<49x128xf32>
    %37 = vector.broadcast %25 : vector<1x128xf32> to vector<49x128xf32>
    %38 = arith.subf %36, %37 : vector<49x128xf32>
    %39 = arith.mulf %38, %38 : vector<49x128xf32>
    %cst_27 = arith.constant dense<0.000000e+00> : vector<128xf32>
    %40 = vector.multi_reduction <add>, %39, %cst_27 [0] : vector<49x128xf32> to vector<128xf32>
    %41 = vector.shape_cast %40 : vector<128xf32> to vector<1x128xf32>
    %42 = arith.addf %34, %41 : vector<1x128xf32>
    %cst_28 = arith.constant 0.0102040814 : f32
    %43 = vector.broadcast %cst_28 : f32 to vector<1x128xf32>
    %44 = arith.mulf %42, %43 : vector<1x128xf32>
    %c0_29 = arith.constant 0 : index
    %c0_30 = arith.constant 0 : index
    %45 = vector.load %arg3[%c0_29, %c0_30] : memref<1x128xf32, #tpu.memory_space<vmem>>, vector<1x128xf32>
    %cst_31 = arith.constant 9.99999974E-6 : f32
    %46 = vector.broadcast %cst_31 : f32 to vector<1x128xf32>
    %47 = arith.addf %44, %46 : vector<1x128xf32>
    %48 = math.rsqrt %47 : vector<1x128xf32>
    %49 = arith.mulf %45, %48 : vector<1x128xf32>
    %c0_32 = arith.constant 0 : index
    %c0_33 = arith.constant 0 : index
    %50 = vector.load %arg4[%c0_32, %c0_33] : memref<1x128xf32, #tpu.memory_space<vmem>>, vector<1x128xf32>
    %51 = arith.mulf %25, %49 : vector<1x128xf32>
    %52 = arith.subf %50, %51 : vector<1x128xf32>
    %c0_34 = arith.constant 0 : index
    %c0_35 = arith.constant 0 : index
    %c0_36 = arith.constant 0 : index
    %53 = vector.load %arg5[%c0_34, %c0_35, %c0_36] : memref<2x49x128xf32, #tpu.memory_space<vmem>>, vector<1x49x128xf32>
    %54 = vector.shape_cast %53 : vector<1x49x128xf32> to vector<49x128xf32>
    %55 = vector.broadcast %49 : vector<1x128xf32> to vector<49x128xf32>
    %56 = arith.mulf %54, %55 : vector<49x128xf32>
    %57 = vector.broadcast %52 : vector<1x128xf32> to vector<49x128xf32>
    %58 = arith.addf %56, %57 : vector<49x128xf32>
    %c0_37 = arith.constant 0 : index
    %c0_38 = arith.constant 0 : index
    %c0_39 = arith.constant 0 : index
    %59 = vector.load %arg5[%c0_37, %c0_38, %c0_39] : memref<2x49x128xf32, #tpu.memory_space<vmem>>, vector<1x49x128xf32>
    %60 = vector.shape_cast %59 : vector<1x49x128xf32> to vector<49x128xf32>
    %61 = vector.shape_cast %58 : vector<49x128xf32> to vector<1x49x128xf32>
    tpu.vector_store %arg5[%c0_37, %c0_38, %c0_39], %61 {strides = array<i32>} : memref<2x49x128xf32, #tpu.memory_space<vmem>>, vector<1x49x128xf32>,
    %c1_40 = arith.constant 1 : index
    %c0_41 = arith.constant 0 : index
    %c0_42 = arith.constant 0 : index
    %62 = vector.load %arg5[%c1_40, %c0_41, %c0_42] : memref<2x49x128xf32, #tpu.memory_space<vmem>>, vector<1x49x128xf32>
    %63 = vector.shape_cast %62 : vector<1x49x128xf32> to vector<49x128xf32>
    %64 = vector.broadcast %49 : vector<1x128xf32> to vector<49x128xf32>
    %65 = arith.mulf %63, %64 : vector<49x128xf32>
    %66 = vector.broadcast %52 : vector<1x128xf32> to vector<49x128xf32>
    %67 = arith.addf %65, %66 : vector<49x128xf32>
    %c1_43 = arith.constant 1 : index
    %c0_44 = arith.constant 0 : index
    %c0_45 = arith.constant 0 : index
    %68 = vector.load %arg5[%c1_43, %c0_44, %c0_45] : memref<2x49x128xf32, #tpu.memory_space<vmem>>, vector<1x49x128xf32>
    %69 = vector.shape_cast %68 : vector<1x49x128xf32> to vector<49x128xf32>
    %70 = vector.shape_cast %67 : vector<49x128xf32> to vector<1x49x128xf32>
    tpu.vector_store %arg5[%c1_43, %c0_44, %c0_45], %70 {strides = array<i32>} : memref<2x49x128xf32, #tpu.memory_space<vmem>>, vector<1x49x128xf32>,
    return
  }
  func.func @transform_0(%arg0: i32) -> (i32, i32, i32) {
    %c0_i32 = arith.constant 0 : i32
    %c0_i32_0 = arith.constant 0 : i32
    %c0_i32_1 = arith.constant 0 : i32
    %c0_i32_2 = arith.constant 0 : i32
    return %c0_i32, %c0_i32_0, %c0_i32_1 : i32, i32, i32
  }
  func.func @transform_1(%arg0: i32) -> (i32, i32) {
    %c0_i32 = arith.constant 0 : i32
    %c0_i32_0 = arith.constant 0 : i32
    return %c0_i32, %arg0 : i32, i32
  }
  func.func @transform_2(%arg0: i32) -> (i32, i32) {
    %c0_i32 = arith.constant 0 : i32
    %c0_i32_0 = arith.constant 0 : i32
    return %c0_i32, %arg0 : i32, i32
  }
  func.func @transform_3(%arg0: i32) -> (i32, i32) {
    %c0_i32 = arith.constant 0 : i32
    %c0_i32_0 = arith.constant 0 : i32
    return %c0_i32, %arg0 : i32, i32
  }
  func.func @transform_4(%arg0: i32) -> (i32, i32, i32) {
    %c0_i32 = arith.constant 0 : i32
    %c0_i32_0 = arith.constant 0 : i32
    %c0_i32_1 = arith.constant 0 : i32
    return %c0_i32, %c0_i32_0, %arg0 : i32, i32, i32
  }
}

</mosaic_0001>

<bundles_post_ra>
// kernel: tpu_custom_call.1
= control target key start
LH: loop header
LB: loop body
LE: loop exit
PB: predicated region body
PF: predicated region fallthrough
CT: control target
= control target key end

     0   :  { %9 = vsyncpa [#allocation3], 0  ;;  %s1482_s0 = inlined_call_operand.vmem [shape: bf16[2,49,256], index: 0, kind: input, shape index: {}]   ;;  %s1483_s1 = inlined_call_operand.hbm [shape: bf16[256,256], index: 1, kind: input, shape index: {}]   ;;  %s1484_s2 = inlined_call_operand.vmem [shape: f32[1,256], index: 2, kind: input, shape index: {}]   ;;  %s1485_s3 = inlined_call_operand.vmem [shape: f32[1,256], index: 3, kind: input, shape index: {}]   ;;  %s1486_s4 = inlined_call_operand.vmem [shape: f32[2,49,256], index: 4, kind: output, shape index: {}]  }
   0x1   :  { %11 = vsyncpa [#allocation3 + $0x1], 0  ;;  %s1193_s15 = smov 0   ;;  %s1195_s16 = smov 0  }
   0x2   :  { %s1197_s17 = smov 0   ;;  %s1199_s18 = smov 0  }
   0x3 LB: > { %s1212_s19 = sadd.s32 4294967295, %s1163_s18   ;;  %s1215_s20 = sadd.s32 1, %s1163_s18   ;;  %s1163_s18 = sphi %s1199_s18, %s1494_s18   ;;  %s1159_s17 = sphi %s1197_s17, %s1493_s17   ;;  %s1155_s16 = sphi %s1195_s16, %s1492_s16   ;;  %s1151_s15 = sphi %s1193_s15, %s1491_s15  }
   0x4   : > { %s42_s21 = ssub.s32 %s1163_s18, %s1215_s20  ;;  %s45_s22 = sadd.s32 1, %s1159_s17 }
   0x5   : > { %p43_p0 = scmp.eq.s32.totalorder %s42_s21, 0  ;;  %p52_p1 = scmp.ne.s32.totalorder %s1159_s17, %s1155_s16 }
   0x6   : > { %p53_p2 = scmp.eq.s32.totalorder %s1163_s18, 0  ;;  %p58_p3 = scmp.ne.s32.totalorder %s1155_s16, %s1151_s15 }
   0x7   : > { %s1225_s23 = scalar_select %p43_p0, %s1159_s17, %s45_s22  }
   0x8   : > { %p1227_p4 = por %p53_p2, %p52_p1  ;;  %p59_p5 = scmp.eq.s32.totalorder %s1212_s19, 0 }
   0x9   : > { %p134_p6 = scmp.eq.s32.totalorder %s1212_s19, 1  ;;  %p1061_p8 = scmp.lt.s32.totalorder %s1163_s18, 2 }
   0xa   : > { %p1233_p7 = por %p59_p5, %p58_p3  ;;  %s163_s27 = sand.u32 1, %s1159_s17  }
   0xb   : > { %p1238_p9 = por %p134_p6, %p52_p1  ;;  %s932_s28 = sshll.u32 %s163_s27, 7 }
   0xc   : > { %s933_s29 = sshll.u32 %s1163_s18, 2  ;;  %s167_s7 = scalar_lea.vmem [#allocation2], %s932_s28 }
   0xd   : > { %s171_s6 = scalar_lea.hbm %s1483_s1, %s933_s29  ;;  %s174_s8 = sshll.u32 %s167_s7, 4  ;;  %s175_s8 = int_to_ptr.vmem [resolvable:$true] %s174_s8 }
   0xe   : > { %s172_s9 = sshll.u32 %s171_s6, 4  ;;  %p1249_p10 = pnand %p1061_p8, %p1227_p4  ;;  %s173_s9 = int_to_ptr.hbm [resolvable:$true] %s172_s9 }
   0xf   : > { %s164_s11 = scalar_lea.sflag [#allocation3], %s163_s27  ;;  %s1099_s12 = sshra.s32 %s173_s9, 4  ;;  %s1100_s12 = int_to_ptr.hbm [resolvable:$true] %s1099_s12 }
  0x10   : > { %s1101_s13 = scalar_lea.hbm %s1100_s12, 128  ;;  %p1103_p12 = pneg %p1249_p10 }
  0x11   : > { %p1102_p11 = scmp.ne.s32.totalorder %s1100_s12, %s1101_s13  ;;  %s1106_s21 = scalar_lea.hbm %s1483_s1, 256 }
  0x12   : > { %p1107_p1 = scmp.lt.s32.totalorder %s1100_s12, %s1483_s1  ;;  %p1108_p2 = scmp.lt.s32.totalorder %s1106_s21, %s1101_s13 }
  0x13   : > { %p1104_p13 = pnand %p1103_p12, %p1102_p11 }
  0x14   : > { %p1109_p3 = por %p1108_p2, %p1107_p1 }
  0x15   : > { %p1105_p0 = pneg %p1104_p13 }
  0x17   : > { %p1110_p4 = pnand %p1109_p3, %p1105_p0 }
  0x19   : > { %1113 = shalt.err (!%p1110_p4)
}
  0x1a   : > { %s1165_s27 = smov 128   ;;  %s1166_s28 = smov 64  }
  0x1b   : > { %s1167_s29 = smov 4   ;;  %p934_p5 = scmp.ge.s32.totalorder %s1163_s18, 1 }
  0x1c   : > { %1060 = dma.hbm_to_vmem [thread:$0]  (!%p1249_p10), %s173_s9, 2048, %s175_s8, %s164_s11, %s1165_s27, %s1166_s28, %s1167_s29  }
  0x1d   : > { %p194_p6 = scmp.lt.s32.totalorder %s1163_s18, 3 }
  0x1f   : > { %p195_p8 = pnand %p934_p5, %p194_p6 }
  0x20   : > { %s1266_s30 = sand.u32 (!%p195_p8), 1, %s1155_s16  }
  0x21   : > { %198 = sbr.rel (%p195_p8) target bundleno = 365 (0x16d), region = 36  ;;  %s935_s5 = sshll.u32 (!%p195_p8), %s1266_s30, 7 }
  0x22   : > { %s201_s6 = scalar_lea.sflag (!%p195_p8), [#allocation3], %s1266_s30  ;;  %s1270_s7 = scalar_lea.vmem (!%p195_p8), [#allocation2], %s935_s5 }
  0x26   : > { %1146 = dma.done.wait (%p1233_p7), %s201_s6, 2048  }
  0x27   : > { %1148 = vsyncadd (%p1233_p7), %s201_s6, 4294965248  ;;  %v1045_v0 = vld [vmem:[%s1270_s7 + $0x38] sm:$0xff]  ;;  %v1044_v2 = vld [vmem:[%s1270_s7 + $0x30] sm:$0xff]  ;;  %s1054_s15 = smul.u32 112, %s1266_s30  ;;  %vm480_vm0 = vcmask 1040384   ;;  %p235_p7 = scmp.lt.s32.totalorder %s1212_s19, 1 }
  0x28   : > { %v1053_v1 = vld [vmem:[%s1270_s7 + $0x78] sm:$0xff]  ;;  %412 = vmatpush.bf16.msra.mxu0 %v1045_v0  ;;  %v1052_v3 = vld [vmem:[%s1270_s7 + $0x70] sm:$0xff]  ;;  %534 = vmatpush.bf16.msra.mxu2 %v1045_v0  ;;  %v1043_v4 = vld [vmem:[%s1270_s7 + $0x28] sm:$0xff]  ;;  %s1035_s6 = sshll.u32 (%p1238_p9), %s1212_s19, 3 }
  0x29   : > { %440 = vmatpush.bf16.msra.mxu1 %v1053_v1  ;;  %562 = vmatpush.bf16.msra.mxu3 %v1053_v1  ;;  %v1051_v5 = vld [vmem:[%s1270_s7 + $0x68] sm:$0xff]  ;;  %v1042_v6 = vld [vmem:[%s1270_s7 + $0x20] sm:$0xff]  ;;  %v1041_v8 = vld [vmem:[%s1270_s7 + $0x18] sm:$0xff]  ;;  %s1366_s30 = scalar_lea.vmem [#allocation4], %s1054_s15  ;;  %s763_s25 = scalar_lea.vmem (%p1238_p9), %s1486_s4, %s1035_s6 }
  0x2a   : > { %v1050_v7 = vld [vmem:[%s1270_s7 + $0x60] sm:$0xff]  ;;  %v1049_v9 = vld [vmem:[%s1270_s7 + $0x58] sm:$0xff]  ;;  %v1040_v10 = vld [vmem:[%s1270_s7 + $0x10] sm:$0xff]  ;;  %s236_s21 = scalar_select %p235_p7, %s1212_s19, 1 }
  0x2b   : > { %v1048_v11 = vld [vmem:[%s1270_s7 + $0x50] sm:$0xff]  ;;  %v273_v12 = vld [vmem:[%s1482_s0] sm:$0xff]  ;;  %v274_v13 = vld [vmem:[%s1482_s0 + $0x8] sm:$0xff] }
  0x2c   : > { %413 = vmatpush.bf16.msra.mxu0 %v1044_v2  ;;  %535 = vmatpush.bf16.msra.mxu2 %v1044_v2  ;;  %v1000_v14 = vld [vmem:[%s1482_s0 + $0x38] sm:$0xff]  ;;  %v1001_v15 = vld [vmem:[%s1482_s0 + $0x40] sm:$0xff]  ;;  %v280_v16 = vunpack.c.l.bf16 %v273_v12  ;;  %v282_v17 = vunpack.c.l.bf16 %v274_v13  ;;  %v281_v18 = vunpack.c.h.bf16 %v273_v12  ;;  %v283_v19 = vunpack.c.h.bf16 %v274_v13  ;;  %v1039_v20 = vld [vmem:[%s1270_s7 + $0x8] sm:$0xff]  ;;  %s237_s27 = scalar_lea.vmem %s1484_s2, %s236_s21  ;;  %s240_s5 = scalar_lea.vmem %s1485_s3, %s236_s21 }
  0x2d   : > { %441 = vmatpush.bf16.msra.mxu1 %v1052_v3  ;;  %563 = vmatpush.bf16.msra.mxu3 %v1052_v3  ;;  %v1047_v21 = vld [vmem:[%s1270_s7 + $0x48] sm:$0xff]  ;;  %v498_v22 = vunpack.c.l.bf16 %v1000_v14  ;;  %v500_v23 = vunpack.c.l.bf16 %v1001_v15  ;;  %v499_v24 = vunpack.c.h.bf16 %v1000_v14  ;;  %v501_v25 = vunpack.c.h.bf16 %v1001_v15  ;;  %v1038_v30 = vld [vmem:[%s1270_s7] sm:$0xff]  ;;  %v275_v40 = vld [vmem:[%s1482_s0 + $0x10] sm:$0xff] }
  0x2e   : > { %v294_v26 = vmax.f32 %v280_v16, 0.0  ;;  %v296_v27 = vmax.f32 %v282_v17, 0.0  ;;  %v295_v28 = vmax.f32 %v281_v18, 0.0  ;;  %v297_v29 = vmax.f32 %v283_v19, 0.0  ;;  %v1046_v31 = vld [vmem:[%s1270_s7 + $0x40] sm:$0xff]  ;;  %v276_v41 = vld [vmem:[%s1482_s0 + $0x18] sm:$0xff] }
  0x2f   : > { %v512_v32 = vmax.f32 %v498_v22, 0.0  ;;  %v514_v33 = vmax.f32 %v500_v23, 0.0  ;;  %v513_v34 = vmax.f32 %v499_v24, 0.0  ;;  %v515_v35 = vmax.f32 %v501_v25, 0.0  ;;  %v1002_v42 = vld [vmem:[%s1482_s0 + $0x48] sm:$0xff]  ;;  %v1003_v43 = vld [vmem:[%s1482_s0 + $0x50] sm:$0xff] }
  0x30   : > { %414 = vmatpush.bf16.msra.mxu0 %v1043_v4  ;;  %536 = vmatpush.bf16.msra.mxu2 %v1043_v4  ;;  %v308_v36 = vpack.c.bf16 %v296_v27, %v294_v26  ;;  %v309_v37 = vpack.c.bf16 %v297_v29, %v295_v28  ;;  %v284_v44 = vunpack.c.l.bf16 %v275_v40  ;;  %v286_v45 = vunpack.c.l.bf16 %v276_v41  ;;  %v277_v0 = vld [vmem:[%s1482_s0 + $0x20] sm:$0xff]  ;;  %v278_v1 = vld [vmem:[%s1482_s0 + $0x28] sm:$0xff]  ;;  %v1004_v2 = vld [vmem:[%s1482_s0 + $0x58] sm:$0xff] }
  0x31   : > { %442 = vmatpush.bf16.msra.mxu1 %v1051_v5  ;;  %564 = vmatpush.bf16.msra.mxu3 %v1051_v5  ;;  %v526_v38 = vpack.c.bf16 %v514_v33, %v512_v32  ;;  %v527_v39 = vpack.c.bf16 %v515_v35, %v513_v34  ;;  %v285_v46 = vunpack.c.h.bf16 %v275_v40  ;;  %v287_v47 = vunpack.c.h.bf16 %v276_v41  ;;  %v1005_v3 = vld [vmem:[%s1482_s0 + $0x60] sm:$0xff]  ;;  %v279_v24 = vld [vmem:[%s1482_s0 + $0x30] sm:$0x11]  ;;  %v1006_v25 = vld [vmem:[%s1482_s0 + $0x68] sm:$0x11] }
  0x32   : > { %v502_v48 = vunpack.c.l.bf16 %v1002_v42  ;;  %v504_v49 = vunpack.c.l.bf16 %v1003_v43  ;;  %v503_v50 = vunpack.c.h.bf16 %v1002_v42  ;;  %v505_v51 = vunpack.c.h.bf16 %v1003_v43 }
  0x33   : > { %v298_v52 = vmax.f32 %v284_v44, 0.0  ;;  %v300_v53 = vmax.f32 %v286_v45, 0.0  ;;  %v299_v54 = vmax.f32 %v285_v46, 0.0  ;;  %v301_v55 = vmax.f32 %v287_v47, 0.0 }
  0x34   : > { %415 = vmatpush.bf16.msra.mxu0 %v1042_v6  ;;  %537 = vmatpush.bf16.msra.mxu2 %v1042_v6  ;;  %v516_v56 = vmax.f32 %v502_v48, 0.0  ;;  %v518_v57 = vmax.f32 %v504_v49, 0.0  ;;  %v517_v58 = vmax.f32 %v503_v50, 0.0  ;;  %v519_v59 = vmax.f32 %v505_v51, 0.0 }
  0x35   : > { %443 = vmatpush.bf16.msra.mxu1 %v1050_v7  ;;  %565 = vmatpush.bf16.msra.mxu3 %v1050_v7  ;;  %v310_v60 = vpack.c.bf16 %v300_v53, %v298_v52  ;;  %v311_v61 = vpack.c.bf16 %v301_v55, %v299_v54  ;;  %v288_v4 = vunpack.c.l.bf16 %v277_v0  ;;  %v290_v5 = vunpack.c.l.bf16 %v278_v1 }
  0x36   : > { %v528_v62 = vpack.c.bf16 %v518_v57, %v516_v56  ;;  %v529_v63 = vpack.c.bf16 %v519_v59, %v517_v58  ;;  %v289_v6 = vunpack.c.h.bf16 %v277_v0  ;;  %v291_v7 = vunpack.c.h.bf16 %v278_v1 }
  0x37   : > { %v302_v12 = vmax.f32 %v288_v4, 0.0  ;;  %v304_v13 = vmax.f32 %v290_v5, 0.0  ;;  %v292_v26 = vunpack.c.l.bf16 %v279_v24  ;;  %v293_v27 = vunpack.c.h.bf16 %v279_v24 }
  0x38   : > { %416 = vmatpush.bf16.msra.mxu0 %v1041_v8  ;;  %538 = vmatpush.bf16.msra.mxu2 %v1041_v8  ;;  %v506_v8 = vunpack.c.l.bf16 %v1004_v2  ;;  %v303_v14 = vmax.f32 %v289_v6, 0.0  ;;  %v305_v15 = vmax.f32 %v291_v7, 0.0  ;;  %v510_v28 = vunpack.c.l.bf16 %v1006_v25 }
  0x39   : > { %444 = vmatpush.bf16.msra.mxu1 %v1049_v9  ;;  %566 = vmatpush.bf16.msra.mxu3 %v1049_v9  ;;  %v508_v9 = vunpack.c.l.bf16 %v1005_v3  ;;  %v511_v29 = vunpack.c.h.bf16 %v1006_v25 }
  0x3a   : > { %v520_v16 = vmax.f32 %v506_v8, 0.0  ;;  %v524_v32 = vmax.f32 %v510_v28, 0.0 }
  0x3b   : > { %v522_v17 = vmax.f32 %v508_v9, 0.0  ;;  %v525_v33 = vmax.f32 %v511_v29, 0.0 }
  0x3c   : > { %417 = vmatpush.bf16.msra.mxu0 %v1040_v10  ;;  %539 = vmatpush.bf16.msra.mxu2 %v1040_v10  ;;  %v507_v10 = vunpack.c.h.bf16 %v1004_v2 }
  0x3d   : > { %445 = vmatpush.bf16.msra.mxu1 %v1048_v11  ;;  %567 = vmatpush.bf16.msra.mxu3 %v1048_v11  ;;  %v509_v11 = vunpack.c.h.bf16 %v1005_v3  ;;  %v530_v22 = vpack.c.bf16 %v522_v17, %v520_v16 }
  0x3e   : > { %v521_v18 = vmax.f32 %v507_v10, 0.0 }
  0x3f   : > { %v523_v19 = vmax.f32 %v509_v11, 0.0 }
  0x40   : > { %418 = vmatpush.bf16.msra.mxu0 %v1039_v20  ;;  %540 = vmatpush.bf16.msra.mxu2 %v1039_v20  ;;  %v312_v20 = vpack.c.bf16 %v304_v13, %v302_v12 }
  0x41   : > { %446 = vmatpush.bf16.msra.mxu1 %v1047_v21  ;;  %568 = vmatpush.bf16.msra.mxu3 %v1047_v21  ;;  %v313_v21 = vpack.c.bf16 %v305_v15, %v303_v14  ;;  %v531_v23 = vpack.c.bf16 %v523_v19, %v521_v18 }
  0x44   : > { %419 = vmatpush.bf16.msra.mxu0 %v1038_v30  ;;  %541 = vmatpush.bf16.msra.mxu2 %v1038_v30  ;;  %v306_v30 = vmax.f32 %v292_v26, 0.0 }
  0x45   : > { %447 = vmatpush.bf16.msra.mxu1 %v1046_v31  ;;  %569 = vmatpush.bf16.msra.mxu3 %v1046_v31  ;;  %v307_v31 = vmax.f32 %v293_v27, 0.0 }
  0x46   : > { %v314_v34 = vpack.c.bf16 %v306_v30, %v306_v30 }
  0x47   : > { %420 = vmatmul.bf16.vlgmr.msra.gmra.mxu0 %v308_v36  ;;  %542 = vmatmul.bf16.vlgmr.msra.gmra.mxu2 %v526_v38  ;;  %v315_v35 = vpack.c.bf16 %v307_v31, %v307_v31  ;;  %v532_v36 = vpack.c.bf16 %v524_v32, %v524_v32 }
  0x48   : > { %448 = vmatmul.bf16.vlgmr.msra.gmra.mxu1 %v309_v37  ;;  %570 = vmatmul.bf16.vlgmr.msra.gmra.mxu3 %v527_v39  ;;  %v533_v37 = vpack.c.bf16 %v525_v33, %v525_v33 }
  0x57   : > { %425 = vmatmul.bf16.gmra.mxu0 %v310_v60  ;;  %547 = vmatmul.bf16.gmra.mxu2 %v528_v62 }
  0x58   : > { %453 = vmatmul.bf16.gmra.mxu1 %v311_v61  ;;  %575 = vmatmul.bf16.gmra.mxu3 %v529_v63 }
  0x67   : > { %430 = vmatmul.bf16.gmra.mxu0 %v312_v20  ;;  %552 = vmatmul.bf16.gmra.mxu2 %v530_v22 }
  0x68   : > { %458 = vmatmul.bf16.gmra.mxu1 %v313_v21  ;;  %580 = vmatmul.bf16.gmra.mxu3 %v531_v23 }
  0x77   : > { %435 = vmatmul.bf16.gmra.mxu0 %v314_v34  ;;  %557 = vmatmul.bf16.gmra.mxu2 %v532_v36 }
  0x78   : > { %463 = vmatmul.bf16.gmra.mxu1 %v315_v35  ;;  %585 = vmatmul.bf16.gmra.mxu3 %v533_v37 }
  0xc4   : > { %v421_v38 = vpop.f32.mrf.mxu0 }
  0xc5   : > { %v449_v39 = vpop.f32.mrf.mxu1 }
  0xc6   : > { %v1336_v59 = vadd.f32 %v449_v39, %v421_v38 }
  0xca   : > { %v543_v40 = vpop.f32.mrf.mxu2 }
  0xcb   : > { %v571_v41 = vpop.f32.mrf.mxu3 }
  0xcc   : > { %v423_v42 = vpop.f32.mrf.mxu0  ;;  %v1353_v6 = vadd.f32 %v571_v41, %v543_v40 }
  0xcd   : > { %v451_v43 = vpop.f32.mrf.mxu1 }
  0xce   : > { %v1334_v56 = vadd.f32 %v451_v43, %v423_v42 }
  0xd0   : > { %v475_v63 = vadd.f32 %v1334_v56, %v1336_v59 }
  0xd2   : > { %v545_v44 = vpop.f32.mrf.mxu2 }
  0xd3   : > { %v573_v45 = vpop.f32.mrf.mxu3 }
  0xd4   : > { %v426_v46 = vpop.f32.mrf.mxu0  ;;  %v1348_v3 = vadd.f32 %v573_v45, %v545_v44 }
  0xd5   : > { %v454_v47 = vpop.f32.mrf.mxu1 }
  0xd6   : > { %v1338_v60 = vadd.f32 %v454_v47, %v426_v46  ;;  %v598_v13 = vadd.f32 %v1348_v3, %v1353_v6 }
  0xd8   : > { %v476_v1 = vadd.f32 %v475_v63, %v1338_v60 }
  0xda   : > { %v548_v48 = vpop.f32.mrf.mxu2 }
  0xdb   : > { %v576_v49 = vpop.f32.mrf.mxu3 }
  0xdc   : > { %v428_v50 = vpop.f32.mrf.mxu0  ;;  %v1355_v7 = vadd.f32 %v576_v49, %v548_v48 }
  0xdd   : > { %v456_v51 = vpop.f32.mrf.mxu1 }
  0xde   : > { %v1342_v0 = vadd.f32 %v456_v51, %v428_v50  ;;  %v599_v17 = vadd.f32 %v598_v13, %v1355_v7 }
  0xe0   : > { %v477_v4 = vadd.f32 %v476_v1, %v1342_v0 }
  0xe2   : > { %v550_v52 = vpop.f32.mrf.mxu2 }
  0xe3   : > { %v578_v53 = vpop.f32.mrf.mxu3 }
  0xe4   : > { %v431_v54 = vpop.f32.mrf.mxu0  ;;  %v1360_v14 = vadd.f32 %v578_v53, %v550_v52 }
  0xe5   : > { %v459_v55 = vpop.f32.mrf.mxu1 }
  0xe6   : > { %v1346_v2 = vadd.f32 %v459_v55, %v431_v54  ;;  %v600_v21 = vadd.f32 %v599_v17, %v1360_v14 }
  0xe8   : > { %v478_v10 = vadd.f32 %v477_v4, %v1346_v2 }
  0xea   : > { %v553_v57 = vpop.f32.mrf.mxu2 }
  0xeb   : > { %v581_v58 = vpop.f32.mrf.mxu3 }
  0xec   : > { %v433_v61 = vpop.f32.mrf.mxu0  ;;  %v1364_v18 = vadd.f32 %v581_v58, %v553_v57 }
  0xed   : > { %v461_v62 = vpop.f32.mrf.mxu1 }
  0xee   : > { %v1351_v5 = vadd.f32 %v461_v62, %v433_v61  ;;  %v601_v24 = vadd.f32 %v600_v21, %v1364_v18 }
  0xf0   : > { %v479_v16 = vadd.f32 %v478_v10, %v1351_v5 }
  0xf2   : > { %v555_v8 = vpop.f32.mrf.mxu2 }
  0xf3   : > { %v583_v9 = vpop.f32.mrf.mxu3 }
  0xf4   : > { %v436_v11 = vpop.f32.mrf.mxu0  ;;  %v1371_v22 = vadd.f32 %v583_v9, %v555_v8 }
  0xf5   : > { %v464_v12 = vpop.f32.mrf.mxu1 }
  0xf6   : > { %v465_v15 = vadd.f32 %v464_v12, %v436_v11  ;;  %v602_v31 = vadd.f32 %v601_v24, %v1371_v22 }
  0xf8   : > { %474 = vst [vmem:[%s1366_s30 + $0x30] sm:$0x1] %v465_v15  ;;  %v481_v19 = vsel %vm480_vm0, %v465_v15, 0.0 }
  0xf9   : > { %v482_v20 = vadd.f32 %v481_v19, %v479_v16 }
  0xfa   : > { %v558_v25 = vpop.f32.mrf.mxu2 }
  0xfb   : > { %v483_v23 = vrot.slane %v482_v20, 4  ;;  %v586_v26 = vpop.f32.mrf.mxu3 }
  0xfc   : > { %v587_v28 = vadd.f32 %v586_v26, %v558_v25  ;;  %v438_v29 = vpop.f32.mrf.mxu0 }
  0xfd   : > { %v484_v27 = vadd.f32 %v483_v23, %v482_v20  ;;  %v466_v30 = vpop.f32.mrf.mxu1 }
  0xfe   : > { %1013 = vst [vmem:[%s1366_s30 + $0x68] sm:$0x1] %v587_v28  ;;  %v603_v32 = vsel %vm480_vm0, %v587_v28, 0.0 }
  0xff   : > { %v485_v33 = vrot.slane %v484_v27, 2  ;;  %v604_v34 = vadd.f32 %v603_v32, %v602_v31  ;;  %v1394_v58 = vld [vmem:[%s1366_s30 + $0x30] sm:$0x1] }
 0x101   : > { %v605_v35 = vrot.slane %v604_v34, 4  ;;  %v486_v36 = vadd.f32 %v485_v33, %v484_v27 }
 0x102   : > { %v560_v38 = vpop.f32.mrf.mxu2 }
 0x103   : > { %v606_v37 = vadd.f32 %v605_v35, %v604_v34  ;;  %v588_v39 = vpop.f32.mrf.mxu3  ;;  %v487_v41 = vrot.slane %v486_v36, 1 }
 0x105   : > { %v607_v40 = vrot.slane %v606_v37, 2  ;;  %v488_v44 = vadd.f32 %v487_v41, %v486_v36  ;;  %v1020_v16 = vld [vmem:[%s1366_s30 + $0x68] sm:$0x1] }
 0x107   : > { %v608_v42 = vadd.f32 %v607_v40, %v606_v37 }
 0x109   : > { %v609_v43 = vrot.slane %v608_v42, 1 }
 0x10b   : > { %v610_v45 = vadd.f32 %v609_v43, %v608_v42 }
 0x10d   : > { %v611_v46 = vadd.f32 %v610_v45, %v488_v44 }
 0x10f   : > { %v1377_v47 = vmul.f32 0.010204081, %v611_v46 }
 0x111   : > { %v620_v48 = vsub.f32 %v1336_v59, %v1377_v47  ;;  %v621_v49 = vsub.f32 %v1334_v56, %v1377_v47  ;;  %v622_v50 = vsub.f32 %v1338_v60, %v1377_v47  ;;  %v655_v51 = vsub.f32 %v1353_v6, %v1377_v47 }
 0x112   : > { %v623_v52 = vsub.f32 %v1342_v0, %v1377_v47  ;;  %v624_v55 = vsub.f32 %v1346_v2, %v1377_v47  ;;  %v656_v57 = vsub.f32 %v1348_v3, %v1377_v47  ;;  %v657_v63 = vsub.f32 %v1355_v7, %v1377_v47 }
 0x113   : > { %v627_v53 = vmul.f32 %v620_v48, %v620_v48  ;;  %v628_v54 = vmul.f32 %v621_v49, %v621_v49  ;;  %v629_v61 = vmul.f32 %v622_v50, %v622_v50  ;;  %v625_v1 = vsub.f32 %v1351_v5, %v1377_v47 }
 0x114   : > { %v626_v4 = vsub.f32 %v1394_v58, %v1377_v47  ;;  %v662_v8 = vmul.f32 %v655_v51, %v655_v51  ;;  %v630_v9 = vmul.f32 %v623_v52, %v623_v52  ;;  %v658_v11 = vsub.f32 %v1360_v14, %v1377_v47 }
 0x115   : > { %v634_v62 = vadd.f32 %v628_v54, %v627_v53  ;;  %v663_v12 = vmul.f32 %v656_v57, %v656_v57  ;;  %v631_v13 = vmul.f32 %v624_v55, %v624_v55  ;;  %v659_v17 = vsub.f32 %v1364_v18, %v1377_v47 }
 0x116   : > { %v664_v19 = vmul.f32 %v657_v63, %v657_v63  ;;  %v632_v21 = vmul.f32 %v625_v1, %v625_v1  ;;  %v633_v23 = vmul.f32 %v626_v4, %v626_v4  ;;  %v661_v24 = vsub.f32 %v1020_v16, %v1377_v47  ;;  %v684_v4 = vld [vmem:[%s237_s27] sm:$0x1] }
 0x117   : > { %v635_v10 = vadd.f32 %v634_v62, %v629_v61  ;;  %v669_v20 = vadd.f32 %v663_v12, %v662_v8  ;;  %v660_v26 = vsub.f32 %v1371_v22, %v1377_v47  ;;  %v665_v27 = vmul.f32 %v658_v11, %v658_v11  ;;  %v697_v11 = vld [vmem:[%s240_s5] sm:$0x1] }
 0x118   : > { %v666_v30 = vmul.f32 %v659_v17, %v659_v17  ;;  %v639_v32 = vsel %vm480_vm0, %v633_v23, 0.0  ;;  %v668_v33 = vmul.f32 %v661_v24, %v661_v24 }
 0x119   : > { %v636_v15 = vadd.f32 %v635_v10, %v630_v9  ;;  %v670_v28 = vadd.f32 %v669_v20, %v664_v19  ;;  %v667_v35 = vmul.f32 %v660_v26, %v660_v26 }
 0x11a   : > { %v674_v39 = vsel %vm480_vm0, %v668_v33, 0.0 }
 0x11b   : > { %v637_v25 = vadd.f32 %v636_v15, %v631_v13  ;;  %v671_v31 = vadd.f32 %v670_v28, %v665_v27 }
 0x11d   : > { %v638_v29 = vadd.f32 %v637_v25, %v632_v21  ;;  %v672_v36 = vadd.f32 %v671_v31, %v666_v30 }
 0x11f   : > { %v640_v34 = vadd.f32 %v639_v32, %v638_v29  ;;  %v673_v38 = vadd.f32 %v672_v36, %v667_v35 }
 0x121   : > { %v641_v37 = vrot.slane %v640_v34, 4  ;;  %v675_v41 = vadd.f32 %v674_v39, %v673_v38 }
 0x123   : > { %v642_v40 = vadd.f32 %v641_v37, %v640_v34  ;;  %v676_v43 = vrot.slane %v675_v41, 4 }
 0x125   : > { %v643_v42 = vrot.slane %v642_v40, 2  ;;  %v677_v45 = vadd.f32 %v676_v43, %v675_v41 }
 0x127   : > { %v644_v44 = vadd.f32 %v643_v42, %v642_v40  ;;  %v678_v48 = vrot.slane %v677_v45, 2 }
 0x129   : > { %v645_v46 = vrot.slane %v644_v44, 1  ;;  %v679_v49 = vadd.f32 %v678_v48, %v677_v45 }
 0x12b   : > { %v646_v50 = vadd.f32 %v645_v46, %v644_v44  ;;  %v680_v51 = vrot.slane %v679_v49, 1 }
 0x12d   : > { %v681_v52 = vadd.f32 %v680_v51, %v679_v49 }
 0x12f   : > { %v682_v53 = vadd.f32 %v681_v52, %v646_v50 }
 0x131   : > { %v683_v54 = vmul.f32 0.010204081, %v682_v53 }
 0x133   : > { %v685_v55 = vadd.f32 1e-05, %v683_v54 }
 0x135   : > { %1097 = vrsqrt.f32 %v685_v55  ;;  %vm692_vm2 = vweird.f32 %v685_v55 }
 0x13b   : > { %v1098_v57 = vpop.eup %1097 }
 0x13c   : > { %v687_v61 = vmul.f32 %v1098_v57, %v685_v55  ;;  %vm693_vm1 = vweird.f32 %v1098_v57 }
 0x13d   : > { %vm694_vm3 = vmor %vm692_vm2, %vm693_vm1 }
 0x13e   : > { %v688_v62 = vmul.f32 %v1098_v57, %v687_v61 }
 0x140   : > { %v689_v63 = vmul.f32 0.5, %v688_v62 }
 0x142   : > { %v690_v1 = vsub.f32 1.5, %v689_v63 }
 0x144   : > { %v691_v8 = vmul.f32 %v1098_v57, %v690_v1 }
 0x146   : > { %v695_v9 = vsel %vm694_vm3, %v1098_v57, %v691_v8 }
 0x147   : > { %v696_v10 = vmul.f32 %v695_v9, %v684_v4 }
 0x149   : > { %v698_v12 = vmul.f32 %v696_v10, %v1377_v47  ;;  %v701_v13 = vperm.slane %v696_v10, 0 }
 0x14b   : > { %v699_v15 = vsub.f32 %v697_v11, %v698_v12  ;;  %v703_v16 = vmul.f32 %v701_v13, %v1336_v59  ;;  %v704_v17 = vmul.f32 %v701_v13, %v1334_v56  ;;  %v705_v19 = vmul.f32 %v701_v13, %v1338_v60 }
 0x14c   : > { %v706_v21 = vmul.f32 %v701_v13, %v1342_v0  ;;  %v707_v23 = vmul.f32 %v701_v13, %v1346_v2  ;;  %v708_v26 = vmul.f32 %v701_v13, %v1351_v5  ;;  %v709_v59 = vmul.f32 %v701_v13, %v1394_v58 }
 0x14d   : > { %v711_v20 = vperm.slane %v699_v15, 0  ;;  %v734_v0 = vmul.f32 %v701_v13, %v1353_v6  ;;  %v735_v2 = vmul.f32 %v701_v13, %v1348_v3  ;;  %v736_v5 = vmul.f32 %v701_v13, %v1355_v7  ;;  %v1027_v3 = vld [vmem:[%s1366_s30 + $0x68] sm:$0x1] }
 0x14e   : > { %v737_v58 = vmul.f32 %v701_v13, %v1360_v14  ;;  %v738_v6 = vmul.f32 %v701_v13, %v1364_v18  ;;  %v739_v32 = vmul.f32 %v701_v13, %v1371_v22  ;;  %v740_v33 = vmul.f32 %v1027_v3, %v701_v13 }
 0x14f   : > { %v713_v24 = vadd.f32 %v711_v20, %v703_v16  ;;  %v714_v25 = vadd.f32 %v711_v20, %v704_v17  ;;  %v715_v47 = vadd.f32 %v711_v20, %v705_v19  ;;  %v716_v27 = vadd.f32 %v711_v20, %v706_v21 }
 0x150   : > { %v717_v56 = vadd.f32 %v711_v20, %v707_v23  ;;  %v718_v60 = vadd.f32 %v711_v20, %v708_v26  ;;  %v719_v28 = vadd.f32 %v711_v20, %v709_v59  ;;  %v741_v29 = vadd.f32 %v734_v0, %v711_v20 }
 0x151   : > { %720 = vst [vmem:[%s1366_s30] sm:$0xff] %v713_v24  ;;  %v742_v30 = vadd.f32 %v735_v2, %v711_v20  ;;  %v743_v31 = vadd.f32 %v736_v5, %v711_v20  ;;  %v744_v7 = vadd.f32 %v737_v58, %v711_v20  ;;  %v745_v34 = vadd.f32 %v738_v6, %v711_v20 }
 0x152   : > { %721 = vst [vmem:[%s1366_s30 + $0x8] sm:$0xff] %v714_v25  ;;  %v746_v35 = vadd.f32 %v739_v32, %v711_v20  ;;  %v747_v14 = vadd.f32 %v740_v33, %v711_v20 }
 0x153   : > { %722 = vst [vmem:[%s1366_s30 + $0x10] sm:$0xff] %v715_v47 }
 0x154   : > { %723 = vst [vmem:[%s1366_s30 + $0x18] sm:$0xff] %v716_v27 }
 0x155   : > { %724 = vst [vmem:[%s1366_s30 + $0x20] sm:$0xff] %v717_v56 }
 0x156   : > { %725 = vst [vmem:[%s1366_s30 + $0x28] sm:$0xff] %v718_v60 }
 0x157   : > { %726 = vst [vmem:[%s1366_s30 + $0x30] sm:$0x1] %v719_v28 }
 0x158   : > { %1028 = vst [vmem:[%s1366_s30 + $0x38] sm:$0xff] %v741_v29  ;;  %v818_v18 = vld [vmem:[%s1366_s30] sm:$0xff] (%p1238_p9) }
 0x159   : > { %1029 = vst [vmem:[%s1366_s30 + $0x40] sm:$0xff] %v742_v30  ;;  %v820_v22 = vld [vmem:[%s1366_s30 + $0x8] sm:$0xff] (%p1238_p9) }
 0x15a   : > { %1030 = vst [vmem:[%s1366_s30 + $0x48] sm:$0xff] %v743_v31  ;;  %761 = sbr.rel (!%p1238_p9) target bundleno = 365 (0x16d), region = 44  ;;  %v822_v36 = vld [vmem:[%s1366_s30 + $0x10] sm:$0xff] (%p1238_p9) }
 0x15b   : > { %1031 = vst [vmem:[%s1366_s30 + $0x50] sm:$0xff] %v744_v7  ;;  %v824_v37 = vld [vmem:[%s1366_s30 + $0x18] sm:$0xff] (%p1238_p9) }
 0x15c   : > { %1032 = vst [vmem:[%s1366_s30 + $0x58] sm:$0xff] %v745_v34  ;;  %v826_v38 = vld [vmem:[%s1366_s30 + $0x20] sm:$0xff] (%p1238_p9) }
 0x15d   : > { %1033 = vst [vmem:[%s1366_s30 + $0x60] sm:$0xff] %v746_v35  ;;  %v828_v39 = vld [vmem:[%s1366_s30 + $0x28] sm:$0xff] (%p1238_p9) }
 0x15e   : > { %1034 = vst [vmem:[%s1366_s30 + $0x68] sm:$0x1] %v747_v14  ;;  %v830_v40 = vld [vmem:[%s1366_s30 + $0x30] sm:$0xff] (%p1238_p9) }
 0x15f   : > { %819 = vst [vmem:[%s763_s25] sm:$0xff] %v818_v18  ;;  %v832_v41 = vld [vmem:[%s1366_s30 + $0x38] sm:$0xff] }
 0x160   : > { %821 = vst [vmem:[%s763_s25 + $0x10] sm:$0xff] %v820_v22  ;;  %v834_v42 = vld [vmem:[%s1366_s30 + $0x40] sm:$0xff] }
 0x161   : > { %823 = vst [vmem:[%s763_s25 + $0x20] sm:$0xff] %v822_v36  ;;  %v836_v43 = vld [vmem:[%s1366_s30 + $0x48] sm:$0xff] }
 0x162   : > { %825 = vst [vmem:[%s763_s25 + $0x30] sm:$0xff] %v824_v37  ;;  %v838_v44 = vld [vmem:[%s1366_s30 + $0x50] sm:$0xff] }
 0x163   : > { %827 = vst [vmem:[%s763_s25 + $0x40] sm:$0xff] %v826_v38  ;;  %v840_v45 = vld [vmem:[%s1366_s30 + $0x58] sm:$0xff] }
 0x164   : > { %829 = vst [vmem:[%s763_s25 + $0x50] sm:$0xff] %v828_v39  ;;  %v842_v46 = vld [vmem:[%s1366_s30 + $0x60] sm:$0xff] }
 0x165   : > { %831 = vst [vmem:[%s763_s25 + $0x60] sm:$0xff] %v830_v40  ;;  %v844_v48 = vld [vmem:[%s1366_s30 + $0x68] sm:$0xff] }
 0x166   : > { %833 = vst [vmem:[%s763_s25 + $0x70] sm:$0xff] %v832_v41 }
 0x167   : > { %835 = vst [vmem:[%s763_s25 + $0x80] sm:$0xff] %v834_v42 }
 0x168   : > { %837 = vst [vmem:[%s763_s25 + $0x90] sm:$0xff] %v836_v43 }
 0x169   : > { %839 = vst [vmem:[%s763_s25 + $0xa0] sm:$0xff] %v838_v44 }
 0x16a   : > { %841 = vst [vmem:[%s763_s25 + $0xb0] sm:$0xff] %v840_v45 }
 0x16b   : > { %843 = vst [vmem:[%s763_s25 + $0xc0] sm:$0xff] %v842_v46 }
 0x16c   : > { %845 = vst [vmem:[%s763_s25 + $0xd0] sm:$0xff] %v844_v48 }
 0x16d PF: > { %p14_p9 = scmp.ge.s32.totalorder %s1215_s20, 4   ;;  %s1491_s15 = smov %s1155_s16 }
 0x16e   : > { %s1492_s16 = smov %s1159_s17  ;;  %s1493_s17 = smov %s1225_s23 }
 0x16f   : > { %s1494_s18 = smov %s1215_s20  ;;  %16 = sbr.rel (!%p14_p9) target bundleno = 3 (0x3), region = 122 }
 0x174   :  { %861 = vsyncpa [#allocation3], 1 }
 0x175   :  { %863 = vsyncpa [#allocation3 + $0x1], 1 }

</bundles_post_ra>
